<compile_context>
chip_gen: v6e
topology: v6e:2x2x1
jax: 0.10.0
libtpu: 0.0.40
codegen_flags: <defaults>
</compile_context>

<pallas_src>
import jax
import jax.numpy as jnp
from jax.experimental import pallas as pl
from jax.experimental.pallas import tpu as pltpu

D_IN = 64            # input feature dim consumed by the synthetic embeddingnet
HIDDEN = 2048        # embedding dim (fixed by fc2 = nn.Linear(2048, 201))
NUM_CLASSES = 201    # fc2 output dim
NUM_PAD = 256        # lane-dense padded class dim (multiple of 128)
W_COLS = HIDDEN + NUM_PAD   # fused weight column count (2304)
MAX_TM = 1024        # max batch-tile rows (bf16 emb -> ~11 MiB/step with double-buffering)


def _round_up(x, m):
    return ((x + m - 1) // m) * m


def triplet_fused_kernel(x_ref, w_ref, b_ref, emb_ref, cat_ref):
    x = x_ref[...]                                            # (TM, D_IN) bf16

    # Single MXU pass: [emb | logits] = x @ [W1 | W1@W2]  (+ [b1 | b1@W2 + b2]).
    y = jnp.dot(x, w_ref[...], preferred_element_type=jnp.float32) + b_ref[...]

    # Embedding half (lane-aligned slice at 2048), stored as bf16.
    emb_ref[...] = y[:, :HIDDEN].astype(emb_ref.dtype)

    # Class half: padded columns carry a -1e30 bias -> exp() == 0 -> exact softmax
    # over the real 201 classes.  Numerically stable softmax.
    logits = y[:, HIDDEN:]
    m = jnp.max(logits, axis=-1, keepdims=True)
    e = jnp.exp(logits - m)
    denom = jnp.sum(e, axis=-1, keepdims=True)
    cat_ref[...] = (e * pl.reciprocal(denom, approx=True)).astype(cat_ref.dtype)


def prepare_params(params):
    """One-time host-side prep: fc2 fold + class padding + W1/W12 fusion + bf16 cast."""
    w1, b1, w2, b2 = params["w1"], params["b1"], params["w2"], params["b2"]
    w12 = w1 @ w2                              # (D_IN, NUM_CLASSES), f32 fold
    b2p = b1 @ w2 + b2                         # (1, NUM_CLASSES)

    # Lane-dense padding of the class dim to 256.
    w12_pad = jnp.zeros((D_IN, NUM_PAD), jnp.float32).at[:, :NUM_CLASSES].set(w12)
    b2p_pad = jnp.full((1, NUM_PAD), -1e30, jnp.float32).at[:, :NUM_CLASSES].set(b2p)

    # Fuse into one weight / bias: columns [0:2048] = embedding, [2048:2304] = classes.
    w_cat = jnp.concatenate([w1, w12_pad], axis=1).astype(jnp.bfloat16)   # (D_IN, 2304)
    b_cat = jnp.concatenate([b1, b2p_pad], axis=1).astype(jnp.float32)    # (1, 2304) f32
    return {"w": w_cat, "b": b_cat}


def triplet_net_forward(a, p, n, prep):
    """Mirrors TripletNet.forward: returns (emb_a, emb_p, emb_n, cat_a, cat_p, cat_n)."""
    B = a.shape[0]

    # Leading-axis branch slab (3, B, D_IN); cast to bf16 before stacking so the
    # wrapper makes a single HBM pass and the MXU gets bf16 operands directly.
    x = jnp.stack([a.astype(jnp.bfloat16),
                   p.astype(jnp.bfloat16),
                   n.astype(jnp.bfloat16)], axis=0)

    # Batch tile: multiple of 16 (bf16 sublane pack), capped for VMEM; pad batch.
    tm = min(MAX_TM, _round_up(max(B, 8), 16))
    b_pad = _round_up(B, tm)
    if b_pad != B:
        x = jnp.pad(x, ((0, 0), (0, b_pad - B), (0, 0)))

    grid = (3, b_pad // tm)   # >= 3 steps -> v7x megacore always has work to shard

    emb, cat = pl.pallas_call(
        triplet_fused_kernel,
        out_shape=(
            jax.ShapeDtypeStruct((3, b_pad, HIDDEN), jnp.bfloat16),
            jax.ShapeDtypeStruct((3, b_pad, NUM_PAD), jnp.float32),
        ),
        grid=grid,
        in_specs=[
            pl.BlockSpec((None, tm, D_IN), lambda g, i: (g, i, 0)),   # x tile (branch squeezed)
            pl.BlockSpec((D_IN, W_COLS), lambda g, i: (0, 0)),        # fused [W1 | W1@W2] bf16
            pl.BlockSpec((1, W_COLS), lambda g, i: (0, 0)),           # fused [b1 | b2'] f32
        ],
        out_specs=(
            pl.BlockSpec((None, tm, HIDDEN), lambda g, i: (g, i, 0)),
            pl.BlockSpec((None, tm, NUM_PAD), lambda g, i: (g, i, 0)),
        ),
        compiler_params=pltpu.CompilerParams(
            dimension_semantics=("parallel", "parallel"),
            vmem_limit_bytes=32 * 1024 * 1024,   # headroom above v5e's 16 MiB default
        ),
    )(x, prep["w"], prep["b"])

    emb = emb[:, :B, :]                       # (3, B, HIDDEN) bf16, leading-axis split
    cat = cat[:, :B, :NUM_CLASSES]            # (3, B, 201) f32
    return emb[0], emb[1], emb[2], cat[0], cat[1], cat[2]


def init_params(key):
    k1, k2, k3, k4 = jax.random.split(key, 4)
    # Deterministic synthetic weights (uniform, roughly Kaiming-scaled).
    # TODO(synk): embeddingnet is an injected submodule (e.g. a CNN backbone) in the
    # original code; modeled here as a single Linear(D_IN, 2048).
    w1 = jax.random.uniform(k1, (D_IN, HIDDEN), jnp.float32,
                            minval=-1.0, maxval=1.0) / jnp.sqrt(D_IN)
    b1 = jax.random.uniform(k2, (1, HIDDEN), jnp.float32,
                            minval=-0.01, maxval=0.01)
    w2 = jax.random.uniform(k3, (HIDDEN, NUM_CLASSES), jnp.float32,
                            minval=-1.0, maxval=1.0) / jnp.sqrt(HIDDEN)
    b2 = jax.random.uniform(k4, (1, NUM_CLASSES), jnp.float32,
                            minval=-0.01, maxval=0.01)
    return {"w1": w1, "b1": b1, "w2": w2, "b2": b2}


if __name__ == "__main__":
    key = jax.random.PRNGKey(0)
    kp, ka, kpp, kn = jax.random.split(key, 4)
    params = init_params(kp)
    prep = prepare_params(params)

    B = 2
    a = jax.random.normal(ka, (B, D_IN), jnp.float32)
    p = jax.random.normal(kpp, (B, D_IN), jnp.float32)
    n = jax.random.normal(kn, (B, D_IN), jnp.float32)

    outs = triplet_net_forward(a, p, n, prep)
    outs = jax.block_until_ready(outs)
    emb_a, emb_p, emb_n, cat_a, cat_p, cat_n = outs

    # Sanity checks against the full-f32 module-semantics reference.
    # (bf16 weights/emb + the W1@W2 fold change FP accumulation order, so tolerances
    #  are looser than a pure-f32 version.)
    def ref_branch(x):
        emb = x @ params["w1"] + params["b1"]
        logits = emb @ params["w2"] + params["b2"]
        return emb, jax.nn.softmax(logits, axis=-1)

    ref_ea, ref_ca = ref_branch(a)
    ref_en, ref_cn = ref_branch(n)

    assert emb_a.shape == (B, HIDDEN) and cat_a.shape == (B, NUM_CLASSES)
    assert emb_a.dtype == jnp.bfloat16
    assert jnp.allclose(emb_a.astype(jnp.float32), ref_ea, atol=5e-2, rtol=5e-2)
    assert jnp.allclose(emb_n.astype(jnp.float32), ref_en, atol=5e-2, rtol=5e-2)
    assert jnp.allclose(cat_a, ref_ca, atol=2e-3, rtol=5e-2)
    assert jnp.allclose(cat_n, ref_cn, atol=2e-3, rtol=5e-2)
    assert jnp.allclose(jnp.sum(cat_a, axis=-1), 1.0, atol=5e-3)
    assert jnp.allclose(jnp.sum(cat_p, axis=-1), 1.0, atol=5e-3)
    assert jnp.allclose(jnp.sum(cat_n, axis=-1), 1.0, atol=5e-3)

    print("KERNEL_OK")
</pallas_src>

<mosaic_0001>
module attributes {stable_mosaic.version = 11 : i64} {
  func.func @triplet_fused_kernel(%arg0: i32, %arg1: i32, %arg2: memref<1x16x64xbf16, #tpu.memory_space<vmem>>, %arg3: memref<64x2304xbf16, #tpu.memory_space<vmem>>, %arg4: memref<1x2304xf32, #tpu.memory_space<vmem>>, %arg5: memref<1x16x2048xbf16, #tpu.memory_space<vmem>>, %arg6: memref<1x16x256xf32, #tpu.memory_space<vmem>>) attributes {dimension_semantics = [#tpu.dimension_semantics<parallel>, #tpu.dimension_semantics<parallel>], iteration_bounds = array<i64: 3, 1>, scalar_prefetch = 0 : i64, scratch_operands = 0 : i64, tpu.core_type = #tpu.core_type<tc>, window_params = [{transform_indices = @transform_0, window_bounds = array<i64: 1, 16, 64>}, {pipeline_mode = #tpu.pipeline_mode<synchronous>, transform_indices = @transform_1, window_bounds = array<i64: 64, 2304>}, {pipeline_mode = #tpu.pipeline_mode<synchronous>, transform_indices = @transform_2, window_bounds = array<i64: 1, 2304>}, {transform_indices = @transform_3, window_bounds = array<i64: 1, 16, 2048>}, {transform_indices = @transform_4, window_bounds = array<i64: 1, 16, 256>}]} {
    %c0 = arith.constant 0 : index
    %c0_0 = arith.constant 0 : index
    %c0_1 = arith.constant 0 : index
    %0 = vector.load %arg2[%c0, %c0_0, %c0_1] : memref<1x16x64xbf16, #tpu.memory_space<vmem>>, vector<1x16x64xbf16>
    %1 = vector.shape_cast %0 : vector<1x16x64xbf16> to vector<16x64xbf16>
    %c0_2 = arith.constant 0 : index
    %c0_3 = arith.constant 0 : index
    %2 = vector.load %arg3[%c0_2, %c0_3] : memref<64x2304xbf16, #tpu.memory_space<vmem>>, vector<64x2304xbf16>
    %cst = arith.constant dense<0.000000e+00> : vector<16x2304xf32>
    %3 = tpu.matmul %1, %2, %cst {dimension_numbers = #tpu.dot_dimension_numbers<[1], [0], [0], [1], [0, 0, 1, 1], [], []>} : vector<16x64xbf16>, vector<64x2304xbf16>, vector<16x2304xf32> -> vector<16x2304xf32>
    %c0_4 = arith.constant 0 : index
    %c0_5 = arith.constant 0 : index
    %4 = vector.load %arg4[%c0_4, %c0_5] : memref<1x2304xf32, #tpu.memory_space<vmem>>, vector<1x2304xf32>
    %5 = vector.broadcast %4 : vector<1x2304xf32> to vector<16x2304xf32>
    %6 = arith.addf %3, %5 : vector<16x2304xf32>
    %7 = vector.extract_strided_slice %6 {offsets = [0, 0], sizes = [16, 2048], strides = [1, 1]} : vector<16x2304xf32> to vector<16x2048xf32>
    %8 = arith.truncf %7 : vector<16x2048xf32> to vector<16x2048xbf16>
    %c0_6 = arith.constant 0 : index
    %c0_7 = arith.constant 0 : index
    %c0_8 = arith.constant 0 : index
    %9 = vector.load %arg5[%c0_6, %c0_7, %c0_8] : memref<1x16x2048xbf16, #tpu.memory_space<vmem>>, vector<1x16x2048xbf16>
    %10 = vector.shape_cast %9 : vector<1x16x2048xbf16> to vector<16x2048xbf16>
    %11 = vector.shape_cast %8 : vector<16x2048xbf16> to vector<1x16x2048xbf16>
    tpu.vector_store %arg5[%c0_6, %c0_7, %c0_8], %11 {strides = array<i32>} : memref<1x16x2048xbf16, #tpu.memory_space<vmem>>, vector<1x16x2048xbf16>,
    %12 = vector.extract_strided_slice %6 {offsets = [0, 2048], sizes = [16, 256], strides = [1, 1]} : vector<16x2304xf32> to vector<16x256xf32>
    %cst_9 = arith.constant dense<0xFF800000> : vector<16xf32>
    %13 = vector.multi_reduction <maximumf>, %12, %cst_9 [1] : vector<16x256xf32> to vector<16xf32>
    %14 = vector.shape_cast %13 : vector<16xf32> to vector<16x1xf32>
    %15 = vector.broadcast %14 : vector<16x1xf32> to vector<16x256xf32>
    %16 = arith.subf %12, %15 : vector<16x256xf32>
    %17 = math.exp %16 : vector<16x256xf32>
    %cst_10 = arith.constant dense<0.000000e+00> : vector<16xf32>
    %18 = vector.multi_reduction <add>, %17, %cst_10 [1] : vector<16x256xf32> to vector<16xf32>
    %19 = vector.shape_cast %18 : vector<16xf32> to vector<16x1xf32>
    %20 = tpu.reciprocal %19 {approx = true} : vector<16x1xf32> -> vector<16x1xf32>
    %21 = vector.broadcast %20 : vector<16x1xf32> to vector<16x256xf32>
    %22 = arith.mulf %17, %21 : vector<16x256xf32>
    %c0_11 = arith.constant 0 : index
    %c0_12 = arith.constant 0 : index
    %c0_13 = arith.constant 0 : index
    %23 = vector.load %arg6[%c0_11, %c0_12, %c0_13] : memref<1x16x256xf32, #tpu.memory_space<vmem>>, vector<1x16x256xf32>
    %24 = vector.shape_cast %23 : vector<1x16x256xf32> to vector<16x256xf32>
    %25 = vector.shape_cast %22 : vector<16x256xf32> to vector<1x16x256xf32>
    tpu.vector_store %arg6[%c0_11, %c0_12, %c0_13], %25 {strides = array<i32>} : memref<1x16x256xf32, #tpu.memory_space<vmem>>, vector<1x16x256xf32>,
    return
  }
  func.func @transform_0(%arg0: i32, %arg1: i32) -> (i32, i32, i32) {
    %c0_i32 = arith.constant 0 : i32
    %c0_i32_0 = arith.constant 0 : i32
    return %arg0, %arg1, %c0_i32 : i32, i32, i32
  }
  func.func @transform_1(%arg0: i32, %arg1: i32) -> (i32, i32) {
    %c0_i32 = arith.constant 0 : i32
    %c0_i32_0 = arith.constant 0 : i32
    %c0_i32_1 = arith.constant 0 : i32
    return %c0_i32, %c0_i32_0 : i32, i32
  }
  func.func @transform_2(%arg0: i32, %arg1: i32) -> (i32, i32) {
    %c0_i32 = arith.constant 0 : i32
    %c0_i32_0 = arith.constant 0 : i32
    %c0_i32_1 = arith.constant 0 : i32
    return %c0_i32, %c0_i32_0 : i32, i32
  }
  func.func @transform_3(%arg0: i32, %arg1: i32) -> (i32, i32, i32) {
    %c0_i32 = arith.constant 0 : i32
    %c0_i32_0 = arith.constant 0 : i32
    return %arg0, %arg1, %c0_i32 : i32, i32, i32
  }
  func.func @transform_4(%arg0: i32, %arg1: i32) -> (i32, i32, i32) {
    %c0_i32 = arith.constant 0 : i32
    %c0_i32_0 = arith.constant 0 : i32
    return %arg0, %arg1, %c0_i32 : i32, i32, i32
  }
}

</mosaic_0001>

<bundles_post_ra>
// kernel: tpu_custom_call.1
= control target key start
LH: loop header
LB: loop body
LE: loop exit
PB: predicated region body
PF: predicated region fallthrough
CT: control target
= control target key end

     0   :  { %10 = vsyncpa [#allocation3], 0  ;;  %s2440_s0 = inlined_call_operand.hbm [shape: bf16[3,16,64], index: 0, kind: input, shape index: {}]   ;;  %s2441_s1 = inlined_call_operand.hbm [shape: bf16[64,2304], index: 1, kind: input, shape index: {}]   ;;  %s2442_s2 = inlined_call_operand.hbm [shape: f32[1,2304], index: 2, kind: input, shape index: {}]   ;;  %s2443_s3 = inlined_call_operand.hbm [shape: bf16[3,16,2048], index: 3, kind: output, shape index: {0}]   ;;  %s2444_s4 = inlined_call_operand.hbm [shape: f32[3,16,256], index: 4, kind: output, shape index: {1}]  }
   0x1   :  { %12 = vsyncpa [#allocation3 + $0x1], 0 }
   0x2   :  { %13 = vsyncpa [#allocation6], 0 }
   0x3   :  { %14 = vsyncpa [#allocation4], 0 }
   0x4   :  { %16 = vsyncpa [#allocation4 + $0x1], 0 }
   0x5   :  { %17 = vsyncpa [#allocation10], 0 }
   0x6   :  { %19 = vsyncpa [#allocation10 + $0x1], 0  ;;  %s2125_s15 = smov 0   ;;  %s2127_s16 = smov 0  }
   0x7   :  { %s2129_s17 = smov 0   ;;  %s2131_s18 = smov 0  }
   0x8   :  { %s2133_s19 = smov 0   ;;  %s2135_s20 = smov 0  }
   0x9 LB: > { %s1532_s21 = sadd.s32 4294967295, %s2084_s20   ;;  %s1533_s22 = sadd.s32 4294967294, %s2084_s20   ;;  %s2084_s20 = sphi %s2135_s20, %s25_s20   ;;  %s2080_s19 = sphi %s2133_s19, %s2463_s19   ;;  %s2076_s18 = sphi %s2131_s18, %s2462_s18   ;;  %s2072_s17 = sphi %s2129_s17, %s2461_s17   ;;  %s2068_s16 = sphi %s2127_s16, %s2460_s16   ;;  %s2064_s15 = sphi %s2125_s15, %s2459_s15  }
   0xa   : > { %p59_p0 = scmp.ne.s32.totalorder %s2068_s16, %s2064_s15  ;;  %p2159_p1 = scmp.eq.s32.totalorder %s1532_s21, 0 }
   0xb   : > { %p2163_p2 = scmp.eq.s32.totalorder %s1532_s21, 2  ;;  %p133_p3 = scmp.eq.s32.totalorder %s1533_s22, 2 }
   0xc   : > { %s2448_s23 = scalar_select %p2159_p1, 1, 0 }
   0xd   : > { %p2169_p4 = por %p2159_p1, %p59_p0  ;;  %p1534_p5 = scmp.ge.s32.totalorder %s2084_s20, 1 }
   0xe   : > { %p2174_p6 = por %p133_p3, %p59_p0  ;;  %p168_p7 = scmp.lt.s32.totalorder %s2084_s20, 4 }
   0xf   : > { %s2450_s25 = scalar_select %p2169_p4, 1, 0 }
  0x10   : > { %s2451_s26 = scalar_select %p2174_p6, 1, 0 }
  0x11   : > { %p2179_p8 = pnand %p1534_p5, %p168_p7  ;;  %s2086_s28 = smov [#allocation5]  }
  0x12   : > { %s180_s29 = sshll.u32 %s2086_s28, 4  ;;  %s2087_s5 = smov [#allocation7]   ;;  %s181_s29 = int_to_ptr.vmem [resolvable:$true] %s180_s29 }
  0x13   : > { %p1686_p9 = pneg %p2179_p8  ;;  %s194_s6 = sshll.u32 %s2087_s5, 4  ;;  %s195_s6 = int_to_ptr.vmem [resolvable:$true] %s194_s6 }
  0x14   : > { %s1901_s7 = scalar_lea.vmem %s181_s29, 9216  ;;  %p1909_p3 = scmp.lt.s32.totalorder %s181_s29, %s181_s29 }
  0x15   : > { %p2187_p10 = pnand %p1686_p9, %p2159_p1  ;;  %p1902_p12 = scmp.ne.s32.totalorder %s181_s29, %s1901_s7 }
  0x16   : > { %p1910_p5 = scmp.lt.s32.totalorder %s1901_s7, %s1901_s7 }
  0x17   : > { %p1892_p11 = pneg %p2187_p10 }
  0x18   : > { %p1911_p7 = por %p1910_p5, %p1909_p3 }
  0x19   : > { %p1904_p13 = pnand %p1902_p12, %p1892_p11 }
  0x1b   : > { %p1905_p0 = pneg %p1904_p13 }
  0x1d   : > { %p1912_p9 = pnand %p1911_p7, %p1905_p0 }
  0x1f   : > { %1915 = shalt.err (!%p1912_p9)
}
  0x20   : > { %s2088_s8 = smov 1152   ;;  %s2089_s9 = smov 72  }
  0x21   : > { %1689 = dma.hbm_to_vmem [thread:$0]  (!%p2187_p10), %s2441_s1, 9216, %s181_s29, [#allocation6], %s2088_s8, %s2088_s8, %s2089_s9  }
  0x22   : > { %s1927_s12 = scalar_lea.vmem %s195_s6, 288  ;;  %p1935_p1 = scmp.lt.s32.totalorder %s195_s6, %s195_s6 }
  0x23   : > { %p1928_p6 = scmp.ne.s32.totalorder %s195_s6, %s1927_s12  ;;  %p1936_p4 = scmp.lt.s32.totalorder %s1927_s12, %s1927_s12 }
  0x25   : > { %p1930_p12 = pnand %p1928_p6, %p1892_p11  ;;  %p1937_p3 = por %p1936_p4, %p1935_p1 }
  0x27   : > { %p1931_p13 = pneg %p1930_p12 }
  0x29   : > { %p1938_p0 = pnand %p1937_p3, %p1931_p13 }
  0x2b   : > { %1941 = shalt.err (!%p1938_p0)
}
  0x2c   : > { %1692 = dma.hbm_to_vmem [thread:$0]  (!%p2187_p10), %s2442_s2, 288, %s195_s6, [#allocation6]  }
  0x2d   : > { %s37_s21 = sadd.s32 1, %s2080_s19  ;;  %s46_s22 = sadd.s32 1, %s2072_s17 }
  0x2e   : > { %p39_p1 = scmp.ge.s32.totalorder %s37_s21, 3  ;;  %p53_p4 = scmp.ne.s32.totalorder %s2072_s17, %s2068_s16 }
  0x2f   : > { %p54_p6 = scmp.eq.s32.totalorder %s2084_s20, 0  ;;  %p1706_p11 = scmp.lt.s32.totalorder %s2084_s20, 3 }
  0x30   : > { %s2465_s21 = smov (%p39_p1, %s37_s21), 0  ;;  %p2219_p7 = por %p2163_p2, %p53_p4 }
  0x31   : > { %p55_p5 = por %p54_p6, %p53_p4  ;;  %s41_s29 = ssub.s32 %s2080_s19, %s2465_s21 }
  0x32   : > { %s205_s30 = sand.u32 1, %s2072_s17   ;;  %p44_p9 = scmp.eq.s32.totalorder %s41_s29, 0 }
  0x33   : > { %s1538_s5 = sshll.u32 %s205_s30, 3  ;;  %s1653_s6 = sshll.u32 %s2080_s19, 7 }
  0x34   : > { %s2228_s7 = scalar_select %p44_p9, %s2072_s17, %s46_s22  }
  0x35   : > { %s217_s10 = scalar_lea.hbm %s2440_s0, %s1653_s6  ;;  %s209_s11 = scalar_lea.vmem [#allocation2], %s1538_s5 }
  0x36   : > { %s218_s12 = sshll.u32 %s209_s11, 4  ;;  %p2235_p10 = pnand %p1706_p11, %p55_p5  ;;  %s219_s12 = int_to_ptr.vmem [resolvable:$true] %s218_s12 }
  0x37   : > { %s206_s13 = scalar_lea.sflag [#allocation3], %s205_s30  ;;  %s1955_s14 = scalar_lea.vmem %s219_s12, 128 }
  0x38   : > { %p1944_p2 = pneg %p2235_p10  ;;  %p1956_p12 = scmp.ne.s32.totalorder %s219_s12, %s1955_s14 }
  0x39   : > { %s2090_s22 = smov [#allocation2]  }
  0x3a   : > { %p1958_p13 = pnand %p1956_p12, %p1944_p2  ;;  %s1960_s29 = sshll.u32 %s2090_s22, 4  ;;  %s1961_s29 = int_to_ptr.vmem [resolvable:$false] %s1960_s29 }
  0x3b   : > { %s1962_s6 = scalar_lea.vmem %s1961_s29, 256  ;;  %p1963_p0 = scmp.lt.s32.totalorder %s219_s12, %s1961_s29 }
  0x3c   : > { %p1959_p3 = pneg %p1958_p13  ;;  %p1964_p1 = scmp.lt.s32.totalorder %s1962_s6, %s1955_s14 }
  0x3e   : > { %p1965_p4 = por %p1964_p1, %p1963_p0 }
  0x40   : > { %p1966_p6 = pnand %p1965_p4, %p1959_p3 }
  0x42   : > { %1969 = shalt.err (!%p1966_p6)
}
  0x43   : > { %s2091_s5 = smov 64   ;;  %s2092_s8 = smov 4  }
  0x44   : > { %1696 = dma.hbm_to_vmem [thread:$0]  (!%p2235_p10), %s217_s10, 128, %s219_s12, %s206_s13, %s2091_s5, %s2091_s5, %s2092_s8  }
  0x45   : > { %230 = sbr.rel (%p2179_p8) target bundleno = 690 (0x2b2), region = 32  ;;  %s2246_s30 = sand.u32 (!%p2179_p8), 1, %s2068_s16  }
  0x46   : > { %s1542_s9 = sshll.u32 (!%p2179_p8), %s2246_s30, 3  ;;  %s233_s11 = scalar_lea.sflag (!%p2179_p8), [#allocation3], %s2246_s30 }
  0x47   : > { %s236_s14 = scalar_lea.vmem (!%p2179_p8), [#allocation2], %s1542_s9  ;;  %p2456_p11 = scmp.ne.s32.totalorder (!%p2179_p8), %s2450_s25, 0 }
  0x4a   : > { %2047 = dma.done.wait (%p2456_p11), %s233_s11, 128  }
  0x4b   : > { %2049 = vsyncadd (%p2456_p11), %s233_s11, 4294967168  ;;  %p2457_p5 = scmp.ne.s32.totalorder %s2448_s23, 0 }
  0x4d   : > { %2051 = dma.done.wait (%p2457_p5), [#allocation6], 9504  }
  0x4e   : > { %2053 = vsyncadd (%p2457_p5), [#allocation6], 4294957792  ;;  %v2093_v0 = vmov 0   ;;  %v1769_v1 = vld [vmem:[#allocation5 + $0x1b4] ss:$72 sps:$4 sm:$0xff]   ;;  %vm813_vm0 = vcmask 523264   ;;  %v358_v63 = vlaneseq }
  0x4f   : > { %849 = vmatprep.mubr.bf16.mxu0 %v2093_v0  ;;  %892 = vmatprep.mubr.bf16.mxu1 %v2093_v0  ;;  %v1771_v2 = vld [vmem:[#allocation5 + $0x1b0] ss:$72 sps:$4 sm:$0xff]   ;;  %v1772_v3 = vld [vmem:[#allocation5 + $0x124] ss:$72 sps:$4 sm:$0xff]   ;;  %v1774_v4 = vld [vmem:[#allocation5 + $0x120] ss:$72 sps:$4 sm:$0xff]  }
  0x50   : > { %825 = vmatprep.subr.bf16.mxu0 %v1769_v1  ;;  %v1775_v5 = vld [vmem:[#allocation5 + $0x94] ss:$72 sps:$4 sm:$0xff]   ;;  %v1777_v6 = vld [vmem:[#allocation5 + $0x90] ss:$72 sps:$4 sm:$0xff]   ;;  %v1778_v7 = vld [vmem:[#allocation5 + $0x4] ss:$72 sps:$4 sm:$0xff]  }
  0x51   : > { %826 = vmatpush1.bf16.msra.mxu0 %v1771_v2  ;;  %v1780_v8 = vld [vmem:[#allocation5] ss:$72 sps:$4 sm:$0xff]   ;;  %v1784_v9 = vld [vmem:[#allocation5 + $0x1c4] ss:$72 sps:$4 sm:$0xff]   ;;  %v2260_v10 = vld [vmem:[%s236_s14] sm:$0xff]   ;;  %s1545_s23 = sshll.u32 %s2246_s30, 7 }
  0x52   : > { %827 = vmatprep.subr.bf16.mxu0 %v1772_v3  ;;  %v1782_v11 = vld [vmem:[#allocation5 + $0x1c0] ss:$72 sps:$4 sm:$0xff]   ;;  %v1787_v12 = vld [vmem:[#allocation5 + $0x134] ss:$72 sps:$4 sm:$0xff]   ;;  %v1785_v13 = vld [vmem:[#allocation5 + $0x130] ss:$72 sps:$4 sm:$0xff]  }
  0x53   : > { %v1790_v14 = vld [vmem:[#allocation5 + $0xa4] ss:$72 sps:$4 sm:$0xff]   ;;  %v1788_v15 = vld [vmem:[#allocation5 + $0xa0] ss:$72 sps:$4 sm:$0xff]   ;;  %v1793_v16 = vld [vmem:[#allocation5 + $0x14] ss:$72 sps:$4 sm:$0xff]  }
  0x54   : > { %v1791_v17 = vld [vmem:[#allocation5 + $0x10] ss:$72 sps:$4 sm:$0xff]   ;;  %v1796_v18 = vld [vmem:[#allocation5 + $0x1d4] ss:$72 sps:$4 sm:$0xff]   ;;  %v1799_v20 = vld [vmem:[#allocation5 + $0x144] ss:$72 sps:$4 sm:$0xff]  }
  0x55   : > { %828 = vmatpush1.bf16.msra.mxu0 %v1774_v4  ;;  %v1794_v19 = vld [vmem:[#allocation5 + $0x1d0] ss:$72 sps:$4 sm:$0xff]   ;;  %v1797_v21 = vld [vmem:[#allocation5 + $0x140] ss:$72 sps:$4 sm:$0xff]   ;;  %v1802_v22 = vld [vmem:[#allocation5 + $0xb4] ss:$72 sps:$4 sm:$0xff]  }
  0x56   : > { %829 = vmatprep.subr.bf16.mxu0 %v1775_v5  ;;  %v1800_v23 = vld [vmem:[#allocation5 + $0xb0] ss:$72 sps:$4 sm:$0xff]   ;;  %v1805_v24 = vld [vmem:[#allocation5 + $0x24] ss:$72 sps:$4 sm:$0xff]   ;;  %v1803_v25 = vld [vmem:[#allocation5 + $0x20] ss:$72 sps:$4 sm:$0xff]  }
  0x57   : > { %v1808_v26 = vld [vmem:[#allocation5 + $0x1e4] ss:$72 sps:$4 sm:$0xff]   ;;  %v1806_v27 = vld [vmem:[#allocation5 + $0x1e0] ss:$72 sps:$4 sm:$0xff]   ;;  %v1811_v28 = vld [vmem:[#allocation5 + $0x154] ss:$72 sps:$4 sm:$0xff]  }
  0x58   : > { %v1809_v29 = vld [vmem:[#allocation5 + $0x150] ss:$72 sps:$4 sm:$0xff]   ;;  %v1814_v30 = vld [vmem:[#allocation5 + $0xc4] ss:$72 sps:$4 sm:$0xff]   ;;  %v1812_v31 = vld [vmem:[#allocation5 + $0xc0] ss:$72 sps:$4 sm:$0xff]  }
  0x59   : > { %830 = vmatpush1.bf16.msra.mxu0 %v1777_v6  ;;  %v1817_v32 = vld [vmem:[#allocation5 + $0x34] ss:$72 sps:$4 sm:$0xff]   ;;  %v1815_v33 = vld [vmem:[#allocation5 + $0x30] ss:$72 sps:$4 sm:$0xff]   ;;  %v1823_v36 = vld [vmem:[#allocation5 + $0x164] ss:$72 sps:$4 sm:$0xff]  }
  0x5a   : > { %831 = vmatprep.subr.bf16.mxu0 %v1778_v7  ;;  %v1820_v34 = vld [vmem:[#allocation5 + $0x1f4] ss:$72 sps:$4 sm:$0xff]   ;;  %v1818_v35 = vld [vmem:[#allocation5 + $0x1f0] ss:$72 sps:$4 sm:$0xff]   ;;  %v1821_v37 = vld [vmem:[#allocation5 + $0x160] ss:$72 sps:$4 sm:$0xff]  }
  0x5b   : > { %v1826_v38 = vld [vmem:[#allocation5 + $0xd4] ss:$72 sps:$4 sm:$0xff]   ;;  %v1824_v39 = vld [vmem:[#allocation5 + $0xd0] ss:$72 sps:$4 sm:$0xff]   ;;  %v1829_v40 = vld [vmem:[#allocation5 + $0x44] ss:$72 sps:$4 sm:$0xff]  }
  0x5c   : > { %v1827_v41 = vld [vmem:[#allocation5 + $0x40] ss:$72 sps:$4 sm:$0xff]   ;;  %v1830_v42 = vld [vmem:[#allocation5 + $0x1bc] ss:$72 sps:$4 sm:$0xff]   ;;  %v1833_v44 = vld [vmem:[#allocation5 + $0x12c] ss:$72 sps:$4 sm:$0xff]  }
  0x5d   : > { %832 = vmatpush1.bf16.msra.mxu0 %v1780_v8  ;;  %v1832_v43 = vld [vmem:[#allocation5 + $0x1b8] ss:$72 sps:$4 sm:$0xff]   ;;  %868 = vmatprep.subr.bf16.mxu1 %v1830_v42  ;;  %v1835_v45 = vld [vmem:[#allocation5 + $0x128] ss:$72 sps:$4 sm:$0xff]   ;;  %v1836_v46 = vld [vmem:[#allocation5 + $0x9c] ss:$72 sps:$4 sm:$0xff]  }
  0x5e   : > { %911 = vmatprep.subr.bf16.mxu0 %v1784_v9  ;;  %869 = vmatpush1.bf16.msra.mxu1 %v1832_v43  ;;  %v1838_v47 = vld [vmem:[#allocation5 + $0x98] ss:$72 sps:$4 sm:$0xff]   ;;  %v1839_v48 = vld [vmem:[#allocation5 + $0xc] ss:$72 sps:$4 sm:$0xff]   ;;  %v1841_v49 = vld [vmem:[#allocation5 + $0x8] ss:$72 sps:$4 sm:$0xff]  }
  0x5f   : > { %870 = vmatprep.subr.bf16.mxu1 %v1833_v44  ;;  %v1844_v50 = vld [vmem:[#allocation5 + $0x1cc] ss:$72 sps:$4 sm:$0xff]   ;;  %v1842_v51 = vld [vmem:[#allocation5 + $0x1c8] ss:$72 sps:$4 sm:$0xff]   ;;  %v1847_v52 = vld [vmem:[#allocation5 + $0x13c] ss:$72 sps:$4 sm:$0xff]  }
  0x60   : > { %1620 = vmatmul.mubr.msk.bf16.vlgmr.msra.gmra.mxu0 %vm813_vm0, %v2260_v10  ;;  %v1845_v53 = vld [vmem:[#allocation5 + $0x138] ss:$72 sps:$4 sm:$0xff]   ;;  %v1850_v54 = vld [vmem:[#allocation5 + $0xac] ss:$72 sps:$4 sm:$0xff]   ;;  %v1848_v55 = vld [vmem:[#allocation5 + $0xa8] ss:$72 sps:$4 sm:$0xff]  }
  0x61   : > { %912 = vmatpush1.bf16.msra.mxu0 %v1782_v11  ;;  %935 = vmatprep.mubr.bf16.mxu0 %v2093_v0  ;;  %v1853_v56 = vld [vmem:[#allocation5 + $0x1c] ss:$72 sps:$4 sm:$0xff]   ;;  %v1851_v57 = vld [vmem:[#allocation5 + $0x18] ss:$72 sps:$4 sm:$0xff]   ;;  %v1859_v60 = vld [vmem:[#allocation5 + $0x14c] ss:$72 sps:$4 sm:$0xff]  }
  0x62   : > { %913 = vmatprep.subr.bf16.mxu0 %v1787_v12  ;;  %871 = vmatpush1.bf16.msra.mxu1 %v1835_v45  ;;  %v1856_v58 = vld [vmem:[#allocation5 + $0x1dc] ss:$72 sps:$4 sm:$0xff]   ;;  %v1854_v59 = vld [vmem:[#allocation5 + $0x1d8] ss:$72 sps:$4 sm:$0xff]   ;;  %v1857_v61 = vld [vmem:[#allocation5 + $0x148] ss:$72 sps:$4 sm:$0xff]  }
  0x63   : > { %872 = vmatprep.subr.bf16.mxu1 %v1836_v46  ;;  %v1862_v62 = vld [vmem:[#allocation5 + $0xbc] ss:$72 sps:$4 sm:$0xff]   ;;  %v1860_v1 = vld [vmem:[#allocation5 + $0xb8] ss:$72 sps:$4 sm:$0xff]   ;;  %v1865_v2 = vld [vmem:[#allocation5 + $0x2c] ss:$72 sps:$4 sm:$0xff]  }
  0x64   : > { %v2282_v3 = vshrl.u32 %v358_v63, 7  ;;  %v1863_v4 = vld [vmem:[#allocation5 + $0x28] ss:$72 sps:$4 sm:$0xff]   ;;  %v1868_v5 = vld [vmem:[#allocation5 + $0x1ec] ss:$72 sps:$4 sm:$0xff]   ;;  %v2287_v7 = vld [vmem:[#allocation7] sm:$0xff] }
  0x65   : > { %914 = vmatpush1.bf16.msra.mxu0 %v1785_v13  ;;  %v1866_v8 = vld [vmem:[#allocation5 + $0x1e8] ss:$72 sps:$4 sm:$0xff]   ;;  %v1871_v11 = vld [vmem:[#allocation5 + $0x15c] ss:$72 sps:$4 sm:$0xff]   ;;  %v1869_v13 = vld [vmem:[#allocation5 + $0x158] ss:$72 sps:$4 sm:$0xff]  }
  0x66   : > { %915 = vmatprep.subr.bf16.mxu0 %v1790_v14  ;;  %873 = vmatpush1.bf16.msra.mxu1 %v1838_v47  ;;  %v2285_v6 = vsub.s32 0, %v2282_v3  ;;  %v2290_v9 = vsub.s32 1, %v2282_v3  ;;  %s2300_s25 = scalar_lea.vmem [#allocation8], %s1545_s23  ;;  %v2311_v42 = vld [vmem:[#allocation7 + $0x8] sm:$0xff]  ;;  %s1670_s27 = sshll.u32 %s2076_s18, 11 }
  0x67   : > { %874 = vmatprep.subr.bf16.mxu1 %v1839_v48  ;;  %s1372_s10 = sshll.u32 %s2300_s25, 4  ;;  %s2357_s13 = scalar_lea.hbm %s2443_s3, %s1670_s27  ;;  %s2359_s10 = int_to_ptr.vmem [resolvable:$true] %s1372_s10 }
  0x68   : > { %v361_v12 = vrot.slane %v2287_v7, %v2285_v6  ;;  %v365_v14 = vrot.slane %v2287_v7, %v2290_v9  ;;  %v397_v43 = vrot.slane %v2311_v42, %v2290_v9  ;;  %s1351_s22 = scalar_lea.sflag [#allocation4], %s2246_s30  ;;  %s1970_s29 = scalar_lea.vmem %s2359_s10, 2048 }
  0x69   : > { %916 = vmatpush1.bf16.msra.mxu0 %v1788_v15  ;;  %v1874_v15 = vld [vmem:[#allocation5 + $0xcc] ss:$72 sps:$4 sm:$0xff]   ;;  %p1971_p8 = scmp.ne.s32.totalorder %s2359_s10, %s1970_s29  ;;  %s2094_s6 = smov [#allocation8]  }
  0x6a   : > { %917 = vmatprep.subr.bf16.mxu0 %v1793_v16  ;;  %875 = vmatpush1.bf16.msra.mxu1 %v1841_v49  ;;  %s1974_s5 = sshll.u32 %s2094_s6, 4  ;;  %s1975_s5 = int_to_ptr.vmem [resolvable:$false] %s1974_s5 }
  0x6b   : > { %954 = vmatprep.subr.bf16.mxu1 %v1844_v50  ;;  %p1972_p9 = pnand %p1971_p8, %p2219_p7  ;;  %s1976_s8 = scalar_lea.vmem %s1975_s5, 4096 }
  0x6c   : > { %p1977_p2 = scmp.lt.s32.totalorder %s2359_s10, %s1975_s5  ;;  %p1978_p12 = scmp.lt.s32.totalorder %s1976_s8, %s1970_s29 }
  0x6d   : > { %918 = vmatpush1.bf16.msra.mxu0 %v1791_v17  ;;  %1621 = vmatmul.mubr.msk.bf16.vlgmr.msra.gmra.mxu1 %vm813_vm0, %v2260_v10  ;;  %p1973_p10 = pneg %p1972_p9 }
  0x6e   : > { %997 = vmatprep.subr.bf16.mxu0 %v1796_v18  ;;  %955 = vmatpush1.bf16.msra.mxu1 %v1842_v51  ;;  %p1979_p13 = por %p1978_p12, %p1977_p2 }
  0x6f   : > { %978 = vmatprep.mubr.bf16.mxu1 %v2093_v0  ;;  %956 = vmatprep.subr.bf16.mxu1 %v1847_v52 }
  0x70   : > { %1622 = vmatmul.mubr.msk.bf16.vlgmr.msra.gmra.mxu0 %vm813_vm0, %v2260_v10  ;;  %p1980_p3 = pnand %p1979_p13, %p1973_p10 }
  0x71   : > { %998 = vmatpush1.bf16.msra.mxu0 %v1794_v19  ;;  %1021 = vmatprep.mubr.bf16.mxu0 %v2093_v0  ;;  %v1872_v19 = vld [vmem:[#allocation5 + $0xc8] ss:$72 sps:$4 sm:$0xff]  }
  0x72   : > { %999 = vmatprep.subr.bf16.mxu0 %v1799_v20  ;;  %957 = vmatpush1.bf16.msra.mxu1 %v1845_v53 }
  0x73   : > { %958 = vmatprep.subr.bf16.mxu1 %v1850_v54 }
  0x75   : > { %1000 = vmatpush1.bf16.msra.mxu0 %v1797_v21  ;;  %v1877_v21 = vld [vmem:[#allocation5 + $0x3c] ss:$72 sps:$4 sm:$0xff]  }
  0x76   : > { %1001 = vmatprep.subr.bf16.mxu0 %v1802_v22  ;;  %959 = vmatpush1.bf16.msra.mxu1 %v1848_v55 }
  0x77   : > { %960 = vmatprep.subr.bf16.mxu1 %v1853_v56 }
  0x79   : > { %1002 = vmatpush1.bf16.msra.mxu0 %v1800_v23 }
  0x7a   : > { %1003 = vmatprep.subr.bf16.mxu0 %v1805_v24  ;;  %961 = vmatpush1.bf16.msra.mxu1 %v1851_v57 }
  0x7b   : > { %1040 = vmatprep.subr.bf16.mxu1 %v1856_v58 }
  0x7d   : > { %1004 = vmatpush1.bf16.msra.mxu0 %v1803_v25  ;;  %1623 = vmatmul.mubr.msk.bf16.vlgmr.msra.gmra.mxu1 %vm813_vm0, %v2260_v10  ;;  %v1875_v25 = vld [vmem:[#allocation5 + $0x38] ss:$72 sps:$4 sm:$0xff]  }
  0x7e   : > { %1083 = vmatprep.subr.bf16.mxu0 %v1808_v26  ;;  %1041 = vmatpush1.bf16.msra.mxu1 %v1854_v59 }
  0x7f   : > { %1064 = vmatprep.mubr.bf16.mxu1 %v2093_v0  ;;  %1042 = vmatprep.subr.bf16.mxu1 %v1859_v60 }
  0x80   : > { %1624 = vmatmul.mubr.msk.bf16.vlgmr.msra.gmra.mxu0 %vm813_vm0, %v2260_v10 }
  0x81   : > { %1084 = vmatpush1.bf16.msra.mxu0 %v1806_v27  ;;  %1107 = vmatprep.mubr.bf16.mxu0 %v2093_v0 }
  0x82   : > { %1085 = vmatprep.subr.bf16.mxu0 %v1811_v28  ;;  %1043 = vmatpush1.bf16.msra.mxu1 %v1857_v61  ;;  %v376_v28 = vsub.s32 4, %v2282_v3 }
  0x83   : > { %1044 = vmatprep.subr.bf16.mxu1 %v1862_v62 }
  0x84   : > { %v409_v54 = vrot.slane %v2311_v42, %v376_v28 }
  0x85   : > { %1086 = vmatpush1.bf16.msra.mxu0 %v1809_v29  ;;  %v380_v29 = vsub.s32 5, %v2282_v3 }
  0x86   : > { %1087 = vmatprep.subr.bf16.mxu0 %v1814_v30  ;;  %1045 = vmatpush1.bf16.msra.mxu1 %v1860_v1  ;;  %v377_v30 = vrot.slane %v2287_v7, %v376_v28 }
  0x87   : > { %1046 = vmatprep.subr.bf16.mxu1 %v1865_v2  ;;  %v413_v55 = vrot.slane %v2311_v42, %v380_v29 }
  0x89   : > { %1088 = vmatpush1.bf16.msra.mxu0 %v1812_v31  ;;  %v381_v31 = vrot.slane %v2287_v7, %v380_v29 }
  0x8a   : > { %1089 = vmatprep.subr.bf16.mxu0 %v1817_v32  ;;  %1047 = vmatpush1.bf16.msra.mxu1 %v1863_v4  ;;  %v354_v4 = vld [vmem:[#allocation7 + $0x10] sm:$0x3] }
  0x8b   : > { %1126 = vmatprep.subr.bf16.mxu1 %v1868_v5  ;;  %v425_v5 = vrot.slane %v354_v4, %v2285_v6 }
  0x8d   : > { %1090 = vmatpush1.bf16.msra.mxu0 %v1815_v33  ;;  %1625 = vmatmul.mubr.msk.bf16.vlgmr.msra.gmra.mxu1 %vm813_vm0, %v2260_v10 }
  0x8e   : > { %1169 = vmatprep.subr.bf16.mxu0 %v1820_v34  ;;  %1127 = vmatpush1.bf16.msra.mxu1 %v1866_v8  ;;  %v429_v8 = vrot.slane %v354_v4, %v2290_v9 }
  0x8f   : > { %1150 = vmatprep.mubr.bf16.mxu1 %v2093_v0  ;;  %1128 = vmatprep.subr.bf16.mxu1 %v1871_v11 }
  0x90   : > { %1626 = vmatmul.mubr.msk.bf16.vlgmr.msra.gmra.mxu0 %vm813_vm0, %v2260_v10 }
  0x91   : > { %1170 = vmatpush1.bf16.msra.mxu0 %v1818_v35  ;;  %1193 = vmatprep.mubr.bf16.mxu0 %v2093_v0 }
  0x92   : > { %1171 = vmatprep.subr.bf16.mxu0 %v1823_v36  ;;  %1129 = vmatpush1.bf16.msra.mxu1 %v1869_v13 }
  0x93   : > { %1130 = vmatprep.subr.bf16.mxu1 %v1874_v15 }
  0x95   : > { %1172 = vmatpush1.bf16.msra.mxu0 %v1821_v37 }
  0x96   : > { %1173 = vmatprep.subr.bf16.mxu0 %v1826_v38  ;;  %1131 = vmatpush1.bf16.msra.mxu1 %v1872_v19 }
  0x97   : > { %1132 = vmatprep.subr.bf16.mxu1 %v1877_v21  ;;  %v368_v21 = vsub.s32 2, %v2282_v3 }
  0x99   : > { %1174 = vmatpush1.bf16.msra.mxu0 %v1824_v39  ;;  %v369_v9 = vrot.slane %v2287_v7, %v368_v21 }
  0x9a   : > { %1175 = vmatprep.subr.bf16.mxu0 %v1829_v40  ;;  %1133 = vmatpush1.bf16.msra.mxu1 %v1875_v25 }
  0x9d   : > { %1176 = vmatpush1.bf16.msra.mxu0 %v1827_v41  ;;  %1627 = vmatmul.mubr.msk.bf16.vlgmr.msra.gmra.mxu1 %vm813_vm0, %v2260_v10 }
  0xa0   : > { %1628 = vmatmul.mubr.msk.bf16.vlgmr.msra.gmra.mxu0 %vm813_vm0, %v2260_v10  ;;  %v393_v10 = vrot.slane %v2311_v42, %v2285_v6  ;;  %v372_v6 = vsub.s32 3, %v2282_v3 }
 0x120   : > { %v851_v16 = vpop.f32.mrf.mxu0 }
 0x121   : > { %v852_v17 = vadd.f32 %v851_v16, %v361_v12 }
 0x122   : > { %v853_v18 = vpop.f32.mrf.mxu0 }
 0x123   : > { %v854_v20 = vadd.f32 %v853_v18, %v365_v14 }
 0x124   : > { %v855_v22 = vpop.f32.mrf.mxu0 }
 0x125   : > { %v1654_v23 = vpack.c.bf16 %v854_v20, %v852_v17  ;;  %v856_v0 = vadd.f32 %v855_v22, %v361_v12  ;;  %v373_v22 = vrot.slane %v2287_v7, %v372_v6 }
 0x126   : > { %v857_v24 = vpop.f32.mrf.mxu0 }
 0x127   : > { %1300 = vst [vmem:[%s2300_s25] sm:$0xff] %v1654_v23  ;;  %v858_v26 = vadd.f32 %v857_v24, %v365_v14 }
 0x129   : > { %v1662_v27 = vpack.c.bf16 %v858_v26, %v856_v0 }
 0x12b   : > { %1308 = vst [vmem:[%s2300_s25 + $0x40] sm:$0xff] %v1662_v27 }
 0x12d   : > { %v894_v23 = vpop.f32.mrf.mxu1 }
 0x12e   : > { %v895_v24 = vadd.f32 %v894_v23, %v369_v9 }
 0x12f   : > { %v896_v25 = vpop.f32.mrf.mxu1 }
 0x130   : > { %v937_v32 = vpop.f32.mrf.mxu0  ;;  %v897_v0 = vadd.f32 %v896_v25, %v373_v22 }
 0x131   : > { %v938_v33 = vadd.f32 %v937_v32, %v377_v30  ;;  %v898_v26 = vpop.f32.mrf.mxu1  ;;  %v384_v32 = vsub.s32 6, %v2282_v3 }
 0x132   : > { %v939_v34 = vpop.f32.mrf.mxu0  ;;  %v1655_v27 = vpack.c.bf16 %v897_v0, %v895_v24  ;;  %v899_v28 = vadd.f32 %v898_v26, %v369_v9 }
 0x133   : > { %v940_v35 = vadd.f32 %v939_v34, %v381_v31  ;;  %v900_v29 = vpop.f32.mrf.mxu1  ;;  %v385_v34 = vrot.slane %v2287_v7, %v384_v32 }
 0x134   : > { %v941_v36 = vpop.f32.mrf.mxu0  ;;  %1301 = vst [vmem:[%s2300_s25 + $0x8] sm:$0xff] %v1655_v27 }
 0x135   : > { %v1656_v37 = vpack.c.bf16 %v940_v35, %v938_v33  ;;  %v942_v39 = vadd.f32 %v941_v36, %v377_v30  ;;  %v901_v30 = vadd.f32 %v900_v29, %v373_v22  ;;  %v388_v33 = vsub.s32 7, %v2282_v3 }
 0x136   : > { %v943_v38 = vpop.f32.mrf.mxu0  ;;  %v401_v3 = vrot.slane %v2311_v42, %v368_v21 }
 0x137   : > { %1302 = vst [vmem:[%s2300_s25 + $0x10] sm:$0xff] %v1656_v37  ;;  %v944_v40 = vadd.f32 %v943_v38, %v381_v31  ;;  %v1663_v31 = vpack.c.bf16 %v901_v30, %v899_v28  ;;  %v389_v35 = vrot.slane %v2287_v7, %v388_v33 }
 0x139   : > { %v1664_v41 = vpack.c.bf16 %v944_v40, %v942_v39  ;;  %1309 = vst [vmem:[%s2300_s25 + $0x48] sm:$0xff] %v1663_v31 }
 0x13b   : > { %1310 = vst [vmem:[%s2300_s25 + $0x50] sm:$0xff] %v1664_v41 }
 0x13d   : > { %v980_v36 = vpop.f32.mrf.mxu1 }
 0x13e   : > { %v981_v37 = vadd.f32 %v980_v36, %v385_v34 }
 0x13f   : > { %v982_v38 = vpop.f32.mrf.mxu1 }
 0x140   : > { %v1023_v44 = vpop.f32.mrf.mxu0  ;;  %v983_v39 = vadd.f32 %v982_v38, %v389_v35 }
 0x141   : > { %v1024_v45 = vadd.f32 %v1023_v44, %v393_v10  ;;  %v984_v40 = vpop.f32.mrf.mxu1 }
 0x142   : > { %v1025_v46 = vpop.f32.mrf.mxu0  ;;  %v1657_v41 = vpack.c.bf16 %v983_v39, %v981_v37 }
 0x143   : > { %v1026_v47 = vadd.f32 %v1025_v46, %v397_v43  ;;  %v405_v46 = vrot.slane %v2311_v42, %v372_v6 }
 0x144   : > { %v1027_v48 = vpop.f32.mrf.mxu0  ;;  %1303 = vst [vmem:[%s2300_s25 + $0x18] sm:$0xff] %v1657_v41 }
 0x145   : > { %v1658_v49 = vpack.c.bf16 %v1026_v47, %v1024_v45  ;;  %v1028_v51 = vadd.f32 %v1027_v48, %v393_v10  ;;  %v985_v10 = vadd.f32 %v984_v40, %v385_v34 }
 0x146   : > { %v1029_v50 = vpop.f32.mrf.mxu0 }
 0x147   : > { %1304 = vst [vmem:[%s2300_s25 + $0x20] sm:$0xff] %v1658_v49  ;;  %v1030_v52 = vadd.f32 %v1029_v50, %v397_v43  ;;  %v986_v43 = vpop.f32.mrf.mxu1 }
 0x148   : > { %v987_v44 = vadd.f32 %v986_v43, %v389_v35 }
 0x149   : > { %v1666_v53 = vpack.c.bf16 %v1030_v52, %v1028_v51 }
 0x14a   : > { %v1665_v45 = vpack.c.bf16 %v987_v44, %v985_v10 }
 0x14b   : > { %1312 = vst [vmem:[%s2300_s25 + $0x60] sm:$0xff] %v1666_v53 }
 0x14c   : > { %1311 = vst [vmem:[%s2300_s25 + $0x58] sm:$0xff] %v1665_v45 }
 0x14d   : > { %v1066_v47 = vpop.f32.mrf.mxu1 }
 0x14e   : > { %v1067_v7 = vadd.f32 %v1066_v47, %v401_v3 }
 0x14f   : > { %v1068_v48 = vpop.f32.mrf.mxu1 }
 0x150   : > { %v1109_v56 = vpop.f32.mrf.mxu0  ;;  %v1069_v49 = vadd.f32 %v1068_v48, %v405_v46 }
 0x151   : > { %v1110_v57 = vadd.f32 %v1109_v56, %v409_v54  ;;  %v1070_v50 = vpop.f32.mrf.mxu1 }
 0x152   : > { %v1111_v58 = vpop.f32.mrf.mxu0  ;;  %v1659_v51 = vpack.c.bf16 %v1069_v49, %v1067_v7  ;;  %v1071_v52 = vadd.f32 %v1070_v50, %v401_v3 }
 0x153   : > { %v1112_v59 = vadd.f32 %v1111_v58, %v413_v55  ;;  %v1072_v53 = vpop.f32.mrf.mxu1 }
 0x154   : > { %v1113_v60 = vpop.f32.mrf.mxu0  ;;  %1305 = vst [vmem:[%s2300_s25 + $0x28] sm:$0xff] %v1659_v51 }
 0x155   : > { %v1660_v61 = vpack.c.bf16 %v1112_v59, %v1110_v57  ;;  %v1114_v63 = vadd.f32 %v1113_v60, %v409_v54  ;;  %v1073_v54 = vadd.f32 %v1072_v53, %v405_v46 }
 0x156   : > { %v1115_v62 = vpop.f32.mrf.mxu0 }
 0x157   : > { %1306 = vst [vmem:[%s2300_s25 + $0x30] sm:$0xff] %v1660_v61  ;;  %v1116_v1 = vadd.f32 %v1115_v62, %v413_v55  ;;  %v1667_v55 = vpack.c.bf16 %v1073_v54, %v1071_v52 }
 0x159   : > { %v1668_v2 = vpack.c.bf16 %v1116_v1, %v1114_v63  ;;  %1313 = vst [vmem:[%s2300_s25 + $0x68] sm:$0xff] %v1667_v55 }
 0x15b   : > { %1314 = vst [vmem:[%s2300_s25 + $0x70] sm:$0xff] %v1668_v2 }
 0x160   : > { %v1195_v11 = vpop.f32.mrf.mxu0 }
 0x161   : > { %v1196_v13 = vadd.f32 %v1195_v11, %v425_v5 }
 0x162   : > { %v1197_v12 = vpop.f32.mrf.mxu0 }
 0x163   : > { %v1198_v14 = vadd.f32 %v1197_v12, %v429_v8 }
 0x164   : > { %v1199_v15 = vpop.f32.mrf.mxu0 }
 0x165   : > { %v1316_v16 = vmax.f32 %v1196_v13, %v1198_v14  ;;  %v1200_v18 = vadd.f32 %v1199_v15, %v425_v5 }
 0x166   : > { %v1201_v17 = vpop.f32.mrf.mxu0 }
 0x167   : > { %v1202_v19 = vadd.f32 %v1201_v17, %v429_v8  ;;  %1317 = vmax.xlane.f32.xlu0 %v1316_v16  ;;  %v417_v17 = vrot.slane %v2311_v42, %v384_v32 }
 0x169   : > { %v1319_v20 = vmax.f32 %v1200_v18, %v1202_v19 }
 0x16b   : > { %1320 = vmax.xlane.f32.xlu0 %v1319_v20 }
 0x1f0   : > { %v1318_v56 = vpop.xlane.xlu0 %1317 }
 0x1f1   : > { %v1322_v57 = vsub.f32 %v1196_v13, %v1318_v56  ;;  %v1323_v58 = vsub.f32 %v1198_v14, %v1318_v56  ;;  %v1152_v14 = vpop.f32.mrf.mxu1 }
 0x1f2   : > { %v1153_v20 = vadd.f32 %v1152_v14, %v417_v17 }
 0x1f3   : > { %v1326_v59 = vmul.f32 1.442695, %v1322_v57  ;;  %v1328_v60 = vmul.f32 1.442695, %v1323_v58  ;;  %v1154_v15 = vpop.f32.mrf.mxu1 }
 0x1f4   : > { %v1321_v61 = vpop.xlane.xlu0 %1320 }
 0x1f5   : > { %1878 = vpow2.f32 %v1326_v59  ;;  %v1324_v62 = vsub.f32 %v1200_v18, %v1321_v61  ;;  %v1325_v63 = vsub.f32 %v1202_v19, %v1321_v61  ;;  %v1156_v16 = vpop.f32.mrf.mxu1  ;;  %v421_v18 = vrot.slane %v2311_v42, %v388_v33 }
 0x1f6   : > { %1880 = vpow2.f32 %v1328_v60  ;;  %v1157_v6 = vadd.f32 %v1156_v16, %v417_v17 }
 0x1f7   : > { %v1330_v1 = vmul.f32 1.442695, %v1324_v62  ;;  %v1332_v2 = vmul.f32 1.442695, %v1325_v63  ;;  %v1158_v19 = vpop.f32.mrf.mxu1  ;;  %v1155_v21 = vadd.f32 %v1154_v15, %v421_v18 }
 0x1f8   : > { %v1159_v9 = vadd.f32 %v1158_v19, %v421_v18 }
 0x1f9   : > { %1882 = vpow2.f32 %v1330_v1  ;;  %v1661_v22 = vpack.c.bf16 %v1155_v21, %v1153_v20 }
 0x1fa   : > { %1884 = vpow2.f32 %v1332_v2  ;;  %v1669_v23 = vpack.c.bf16 %v1159_v9, %v1157_v6 }
 0x1fb   : > { %1307 = vst [vmem:[%s2300_s25 + $0x38] sm:$0xff] %v1661_v22 }
 0x1fc   : > { %1315 = vst [vmem:[%s2300_s25 + $0x78] sm:$0xff] %v1669_v23 }
 0x202   : > { %v1879_v4 = vpop.eup %1878 }
 0x203   : > { %v1881_v5 = vpop.eup %1880 }
 0x204   : > { %v1334_v8 = vadd.f32 %v1881_v5, %v1879_v4 }
 0x206   : > { %v2342_v11 = vpop.eup %1882  ;;  %1335 = vadd.xlane.f32.xlu1 %v1334_v8 }
 0x207   : > { %v2344_v12 = vpop.eup %1884 }
 0x208   : > { %v1337_v13 = vadd.f32 %v2344_v12, %v2342_v11 }
 0x20a   : > { %1338 = vadd.xlane.f32.xlu1 %v1337_v13 }
 0x20b   : > { %1983 = shalt.err (!%p1980_p3)
}
 0x20c   : > { %s1984_s9 = scalar_lea.hbm %s2357_s13, 2048  ;;  %s1988_s23 = scalar_lea.hbm %s2443_s3, 6144 }
 0x20d   : > { %p1985_p0 = scmp.ne.s32.totalorder %s2357_s13, %s1984_s9  ;;  %p1989_p6 = scmp.lt.s32.totalorder %s2357_s13, %s2443_s3 }
 0x20e   : > { %p1990_p11 = scmp.lt.s32.totalorder %s1988_s23, %s1984_s9 }
 0x20f   : > { %p1986_p1 = pnand %p1985_p0, %p2219_p7 }
 0x210   : > { %p1991_p5 = por %p1990_p11, %p1989_p6 }
 0x211   : > { %p1987_p4 = pneg %p1986_p1 }
 0x213   : > { %p1992_p8 = pnand %p1991_p5, %p1987_p4 }
 0x215   : > { %1995 = shalt.err (!%p1992_p8)
}
 0x216   : > { %s2095_s12 = smov 1024   ;;  %s2096_s24 = smov 64  }
 0x217   : > { %1682 = dma.vmem_to_hbm [thread:$0]  (%p2219_p7), %s2359_s10, 2048, %s2357_s13, %s1351_s22, %s2095_s12, %s2095_s12, %s2096_s24  }
 0x218   : > { %s1546_s29 = sshll.u32 %s2246_s30, 5  ;;  %s1671_s6 = sshll.u32 %s2076_s18, 9 }
 0x219   : > { %s273_s5 = scalar_lea.vmem [#allocation9], %s1546_s29  ;;  %s2389_s10 = scalar_lea.hbm %s2444_s4, %s1671_s6 }
 0x21a   : > { %s1391_s8 = sshll.u32 %s273_s5, 4  ;;  %s1356_s18 = scalar_lea.sflag [#allocation10], %s2246_s30  ;;  %s2391_s8 = int_to_ptr.vmem [resolvable:$true] %s1391_s8 }
 0x21b   : > { %s1996_s13 = scalar_lea.vmem %s2391_s8, 512  ;;  %s2097_s22 = smov [#allocation9]  }
 0x21c   : > { %p1997_p9 = scmp.ne.s32.totalorder %s2391_s8, %s1996_s13  ;;  %s2000_s14 = sshll.u32 %s2097_s22, 4  ;;  %s2001_s14 = int_to_ptr.vmem [resolvable:$false] %s2000_s14 }
 0x21d   : > { %s2002_s23 = scalar_lea.vmem %s2001_s14, 1024  ;;  %p2003_p12 = scmp.lt.s32.totalorder %s2391_s8, %s2001_s14 }
 0x21e   : > { %p1998_p10 = pnand %p1997_p9, %p2219_p7  ;;  %p2004_p13 = scmp.lt.s32.totalorder %s2002_s23, %s1996_s13 }
 0x220   : > { %p1999_p2 = pneg %p1998_p10  ;;  %p2005_p3 = por %p2004_p13, %p2003_p12 }
 0x222   : > { %p2006_p0 = pnand %p2005_p3, %p1999_p2 }
 0x28f   : > { %v1336_v42 = vpop.xlane.xlu1 %1335 }
 0x290   : > { %1886 = vrcp.f32 %v1336_v42 }
 0x293   : > { %v1339_v24 = vpop.xlane.xlu1 %1338 }
 0x294   : > { %1888 = vrcp.f32 %v1339_v24 }
 0x29d   : > { %v1887_v25 = vpop.eup %1886 }
 0x29e   : > { %v1342_v0 = vmul.f32 %v1887_v25, %v1879_v4  ;;  %v1343_v26 = vmul.f32 %v1887_v25, %v1881_v5 }
 0x2a0   : > { %1346 = vst [vmem:[%s273_s5] sm:$0xff] %v1342_v0  ;;  %1347 = vst [vmem:[%s273_s5 + $0x8] sm:$0xff] %v1343_v26 }
 0x2a1   : > { %v1889_v27 = vpop.eup %1888 }
 0x2a2   : > { %v1344_v28 = vmul.f32 %v1889_v27, %v2342_v11  ;;  %v1345_v29 = vmul.f32 %v1889_v27, %v2344_v12 }
 0x2a4   : > { %1348 = vst [vmem:[%s273_s5 + $0x10] sm:$0xff] %v1344_v28  ;;  %1349 = vst [vmem:[%s273_s5 + $0x18] sm:$0xff] %v1345_v29 }
 0x2a5   : > { %2009 = shalt.err (!%p2006_p0)
}
 0x2a6   : > { %s2010_s25 = scalar_lea.hbm %s2389_s10, 512  ;;  %s2014_s24 = scalar_lea.hbm %s2444_s4, 1536 }
 0x2a7   : > { %p2011_p1 = scmp.ne.s32.totalorder %s2389_s10, %s2010_s25  ;;  %p2015_p11 = scmp.lt.s32.totalorder %s2389_s10, %s2444_s4 }
 0x2a8   : > { %p2016_p5 = scmp.lt.s32.totalorder %s2014_s24, %s2010_s25 }
 0x2a9   : > { %p2012_p4 = pnand %p2011_p1, %p2219_p7 }
 0x2aa   : > { %p2017_p8 = por %p2016_p5, %p2015_p11 }
 0x2ab   : > { %p2013_p6 = pneg %p2012_p4 }
 0x2ad   : > { %p2018_p9 = pnand %p2017_p8, %p2013_p6 }
 0x2af   : > { %2021 = shalt.err (!%p2018_p9)
}
 0x2b0   : > { %s2098_s5 = smov 256   ;;  %s2099_s9 = smov 16  }
 0x2b1   : > { %1683 = dma.vmem_to_hbm [thread:$0]  (%p2219_p7), %s2391_s8, 512, %s2389_s10, %s1356_s18, %s2098_s5, %s2098_s5, %s2099_s9  }
 0x2b2 PF: > { %p1709_p10 = scmp.ge.s32.totalorder %s2084_s20, 2  ;;  %s1406_s11 = sand.u32 1, %s2064_s15  }
 0x2b3   : > { %p2458_p2 = scmp.ne.s32.totalorder %s2451_s26, 0  ;;  %s1407_s13 = scalar_lea.sflag [#allocation4], %s1406_s11 }
 0x2b5   : > { %p1698_p12 = pnand %p1709_p10, %p2458_p2 }
 0x2b7   : > { %p1699_p13 = pneg %p1698_p12 }
 0x2b9   : > { %2055 = dma.done.wait (%p1699_p13), %s1407_s13, 2048  }
 0x2ba   : > { %2057 = vsyncadd (%p1699_p13), %s1407_s13, 4294965248  ;;  %s1416_s22 = scalar_lea.sflag [#allocation10], %s1406_s11 }
 0x2bb   : > { %2059 = dma.done.wait (%p1699_p13), %s1416_s22, 512  }
 0x2bc   : > { %2061 = vsyncadd (%p1699_p13), %s1416_s22, 4294966784  ;;  %s25_s20 = sadd.s32 1, %s2084_s20   ;;  %s2459_s15 = smov %s2068_s16 }
 0x2bd   : > { %p22_p3 = scmp.ge.s32.totalorder %s25_s20, 5   ;;  %s2460_s16 = smov %s2072_s17 }
 0x2be   : > { %s2461_s17 = smov %s2228_s7  ;;  %s2462_s18 = smov %s2080_s19 }
 0x2bf   : > { %s2463_s19 = smov %s2465_s21  ;;  %24 = sbr.rel (!%p22_p3) target bundleno = 9 (0x9), region = 102 }
 0x2c4   :  { %1421 = vsyncpa [#allocation3], 1 }
 0x2c5   :  { %1423 = vsyncpa [#allocation3 + $0x1], 1 }
 0x2c6   :  { %1424 = vsyncpa [#allocation6], 1 }
 0x2c7   :  { %1425 = vsyncpa [#allocation4], 1 }
 0x2c8   :  { %1427 = vsyncpa [#allocation4 + $0x1], 1 }
 0x2c9   :  { %1428 = vsyncpa [#allocation10], 1 }
 0x2ca   :  { %1430 = vsyncpa [#allocation10 + $0x1], 1 }

</bundles_post_ra>
